<compile_context>
chip_gen: v7x
topology: tpu7x:2x2x1
jax: 0.10.0
libtpu: 0.0.40
codegen_flags: <defaults>
</compile_context>

<pallas_src>
import jax
import jax.numpy as jnp
from jax.experimental import pallas as pl
from jax.experimental.pallas import tpu as pltpu


def _round_up(x, m):
    return (x + m - 1) // m * m


def _rbm_sample_hidden_kernel(x_ref, w_ref, b_ref, u_ref, o_ref, acc_ref):
    """One (tm, tn) output tile of: out = 1[u < sigmoid(x @ W + b)].

    Grid = (Bp//tm, Hp//tn, Vp//tk). The last grid axis is the contraction;
    partial products accumulate into a resident f32 VMEM scratch and the
    bias/sigmoid/Bernoulli epilogue runs only on the final k step.
    """
    k = pl.program_id(2)

    @pl.when(k == 0)
    def _():
        acc_ref[...] = jnp.zeros_like(acc_ref)

    acc_ref[...] += jnp.dot(
        x_ref[...], w_ref[...], preferred_element_type=jnp.float32
    )

    @pl.when(k == pl.num_programs(2) - 1)
    def _():
        act = acc_ref[...] + b_ref[...].astype(jnp.float32)   # (tm,tn) + (1,tn)
        probs = jax.nn.sigmoid(act)
        o_ref[...] = (u_ref[...] < probs).astype(o_ref.dtype)


def rbm_sample_hidden(x, w, b, key, *, compute_dtype=jnp.bfloat16):
    """One RBM layer: bernoulli(sigmoid(x @ W + b)) via a tiled Pallas kernel."""
    B, V = x.shape
    Vw, H = w.shape
    assert V == Vw, (V, Vw)

    # Fresh uniforms each call ~= torch.bernoulli semantics.
    u = jax.random.uniform(key, (B, H), dtype=jnp.float32)

    # Tile sizes: lane dims multiples of 128, sublane multiples of 8; capped so
    # double-buffered bf16 tiles stay well under the v7x VMEM budget.
    tm = min(256, _round_up(B, 8))
    tn = min(512, _round_up(H, 128))
    tk = min(512, _round_up(V, 128))
    Bp = _round_up(B, tm)
    Hp = _round_up(H, tn)
    Vp = _round_up(V, tk)

    # Zero-pad to tile multiples (zero x cols / W rows leave the matmul exact;
    # padded output rows/cols are sliced off below).
    xp = jnp.pad(x.astype(compute_dtype), ((0, Bp - B), (0, Vp - V)))
    wp = jnp.pad(w.astype(compute_dtype), ((0, Vp - V), (0, Hp - H)))
    bp = jnp.pad(b.astype(jnp.float32), ((0, Hp - H),)).reshape(1, Hp)
    up = jnp.pad(u, ((0, Bp - B), (0, Hp - H)), constant_values=1.0)

    grid = (Bp // tm, Hp // tn, Vp // tk)

    out = pl.pallas_call(
        _rbm_sample_hidden_kernel,
        out_shape=jax.ShapeDtypeStruct((Bp, Hp), compute_dtype),
        grid=grid,
        in_specs=[
            pl.BlockSpec((tm, tk), lambda i, j, k: (i, k)),  # x tile
            pl.BlockSpec((tk, tn), lambda i, j, k: (k, j)),  # W tile (streamed over K)
            pl.BlockSpec((1, tn), lambda i, j, k: (0, j)),   # hidden bias row
            pl.BlockSpec((tm, tn), lambda i, j, k: (i, j)),  # uniforms
        ],
        out_specs=pl.BlockSpec((tm, tn), lambda i, j, k: (i, j)),
        scratch_shapes=[pltpu.VMEM((tm, tn), jnp.float32)],
        compiler_params=pltpu.CompilerParams(
            dimension_semantics=("parallel", "parallel", "arbitrary"),
            vmem_limit_bytes=32 * 1024 * 1024,
        ),
    )(xp, wp, bp, up)

    return out[:B, :H]


class DeepBeliefNetworkPallas:
    """JAX/Pallas port of DeepBeliefNetwork (forward pass only)."""

    def __init__(self, layer_sizes, key):
        self.layer_sizes = tuple(layer_sizes)
        self.params = []
        for i in range(len(layer_sizes) - 1):
            key, wk = jax.random.split(key)
            v, h = layer_sizes[i], layer_sizes[i + 1]
            # Matches torch.randn(v, h) * 0.1 and zero hidden biases.
            w = (0.1 * jax.random.normal(wk, (v, h), dtype=jnp.float32)).astype(
                jnp.bfloat16
            )
            hidden_bias = jnp.zeros((h,), dtype=jnp.float32)
            self.params.append((w, hidden_bias))

    def __call__(self, x, key):
        # TODO(synk): fuse all layers into one pallas_call (activation resident
        # in VMEM, next-layer weight DMA prefetched during current matmul);
        # per-layer calls round-trip the (B, H) activation through HBM.
        for (w, hb) in self.params:
            key, lk = jax.random.split(key)
            x = rbm_sample_hidden(x, w, hb, lk)
        return x.astype(jnp.float32)


if __name__ == "__main__":
    key = jax.random.PRNGKey(0)
    key, xk, pk, sk = jax.random.split(key, 4)

    # Small shapes consistent with the module: 3-layer DBN on (batch, features).
    layer_sizes = [16, 32, 8]
    batch = 4
    x = jax.random.uniform(xk, (batch, layer_sizes[0]), dtype=jnp.float32)

    dbn = DeepBeliefNetworkPallas(layer_sizes, pk)
    out = jax.block_until_ready(dbn(x, sk))

    assert out.shape == (batch, layer_sizes[-1])
    assert out.dtype == jnp.float32
    # Outputs are Bernoulli samples: exactly 0.0 or 1.0.
    assert bool(jnp.all((out == 0.0) | (out == 1.0)))

    print("KERNEL_OK")
</pallas_src>

<mosaic_0001>
module attributes {stable_mosaic.version = 11 : i64} {
  func.func @_rbm_sample_hidden_kernel(%arg0: i32, %arg1: i32, %arg2: i32, %arg3: memref<8x128xbf16, #tpu.memory_space<vmem>>, %arg4: memref<128x128xbf16, #tpu.memory_space<vmem>>, %arg5: memref<1x128xf32, #tpu.memory_space<vmem>>, %arg6: memref<8x128xf32, #tpu.memory_space<vmem>>, %arg7: memref<8x128xbf16, #tpu.memory_space<vmem>>, %arg8: memref<8x128xf32, #tpu.memory_space<vmem>>) attributes {dimension_semantics = [#tpu.dimension_semantics<parallel>, #tpu.dimension_semantics<parallel>, #tpu.dimension_semantics<arbitrary>], iteration_bounds = array<i64: 1, 1, 1>, scalar_prefetch = 0 : i64, scratch_operands = 1 : i64, tpu.core_type = #tpu.core_type<tc>, window_params = [{transform_indices = @transform_0, window_bounds = array<i64: 8, 128>}, {transform_indices = @transform_1, window_bounds = array<i64: 128, 128>}, {transform_indices = @transform_2, window_bounds = array<i64: 1, 128>}, {transform_indices = @transform_3, window_bounds = array<i64: 8, 128>}, {transform_indices = @transform_4, window_bounds = array<i64: 8, 128>}]} {
    %c0_i32 = arith.constant 0 : i32
    %0 = arith.cmpi eq, %arg2, %c0_i32 : i32
    %1 = arith.extui %0 : i1 to i32
    %c0_i32_0 = arith.constant 0 : i32
    %2 = arith.cmpi ne, %1, %c0_i32_0 : i32
    scf.if %2 {
      %cst_10 = arith.constant 0.000000e+00 : f32
      %12 = vector.broadcast %cst_10 : f32 to vector<8x128xf32>
      %c0_11 = arith.constant 0 : index
      %c0_12 = arith.constant 0 : index
      %13 = vector.load %arg8[%c0_11, %c0_12] : memref<8x128xf32, #tpu.memory_space<vmem>>, vector<8x128xf32>
      tpu.vector_store %arg8[%c0_11, %c0_12], %12 {strides = array<i32>} : memref<8x128xf32, #tpu.memory_space<vmem>>, vector<8x128xf32>,
    } else {
    }
    %c0 = arith.constant 0 : index
    %c0_1 = arith.constant 0 : index
    %3 = vector.load %arg8[%c0, %c0_1] : memref<8x128xf32, #tpu.memory_space<vmem>>, vector<8x128xf32>
    %c0_2 = arith.constant 0 : index
    %c0_3 = arith.constant 0 : index
    %4 = vector.load %arg3[%c0_2, %c0_3] : memref<8x128xbf16, #tpu.memory_space<vmem>>, vector<8x128xbf16>
    %c0_4 = arith.constant 0 : index
    %c0_5 = arith.constant 0 : index
    %5 = vector.load %arg4[%c0_4, %c0_5] : memref<128x128xbf16, #tpu.memory_space<vmem>>, vector<128x128xbf16>
    %cst = arith.constant dense<0.000000e+00> : vector<8x128xf32>
    %6 = tpu.matmul %4, %5, %cst {dimension_numbers = #tpu.dot_dimension_numbers<[1], [0], [0], [1], [0, 0, 1, 1], [], []>} : vector<8x128xbf16>, vector<128x128xbf16>, vector<8x128xf32> -> vector<8x128xf32>
    %7 = arith.addf %3, %6 : vector<8x128xf32>
    %c0_6 = arith.constant 0 : index
    %c0_7 = arith.constant 0 : index
    %8 = vector.load %arg8[%c0_6, %c0_7] : memref<8x128xf32, #tpu.memory_space<vmem>>, vector<8x128xf32>
    tpu.vector_store %arg8[%c0_6, %c0_7], %7 {strides = array<i32>} : memref<8x128xf32, #tpu.memory_space<vmem>>, vector<8x128xf32>,
    %c0_i32_8 = arith.constant 0 : i32
    %9 = arith.cmpi eq, %arg2, %c0_i32_8 : i32
    %10 = arith.extui %9 : i1 to i32
    %c0_i32_9 = arith.constant 0 : i32
    %11 = arith.cmpi ne, %10, %c0_i32_9 : i32
    scf.if %11 {
      %c0_10 = arith.constant 0 : index
      %c0_11 = arith.constant 0 : index
      %12 = vector.load %arg8[%c0_10, %c0_11] : memref<8x128xf32, #tpu.memory_space<vmem>>, vector<8x128xf32>
      %c0_12 = arith.constant 0 : index
      %c0_13 = arith.constant 0 : index
      %13 = vector.load %arg5[%c0_12, %c0_13] : memref<1x128xf32, #tpu.memory_space<vmem>>, vector<1x128xf32>
      %14 = vector.broadcast %13 : vector<1x128xf32> to vector<8x128xf32>
      %15 = arith.addf %12, %14 : vector<8x128xf32>
      %16 = arith.negf %15 : vector<8x128xf32>
      %17 = math.exp %16 : vector<8x128xf32>
      %cst_14 = arith.constant 1.000000e+00 : f32
      %18 = vector.broadcast %cst_14 : f32 to vector<8x128xf32>
      %19 = arith.addf %18, %17 : vector<8x128xf32>
      %20 = arith.divf %18, %19 : vector<8x128xf32>
      %c0_15 = arith.constant 0 : index
      %c0_16 = arith.constant 0 : index
      %21 = vector.load %arg6[%c0_15, %c0_16] : memref<8x128xf32, #tpu.memory_space<vmem>>, vector<8x128xf32>
      %22 = arith.cmpf olt, %21, %20 : vector<8x128xf32>
      %23 = arith.extui %22 : vector<8x128xi1> to vector<8x128xi32>
      %24 = arith.sitofp %23 : vector<8x128xi32> to vector<8x128xf32>
      %25 = arith.truncf %24 : vector<8x128xf32> to vector<8x128xbf16>
      %c0_17 = arith.constant 0 : index
      %c0_18 = arith.constant 0 : index
      %26 = vector.load %arg7[%c0_17, %c0_18] : memref<8x128xbf16, #tpu.memory_space<vmem>>, vector<8x128xbf16>
      tpu.vector_store %arg7[%c0_17, %c0_18], %25 {strides = array<i32>} : memref<8x128xbf16, #tpu.memory_space<vmem>>, vector<8x128xbf16>,
    } else {
    }
    return
  }
  func.func @transform_0(%arg0: i32, %arg1: i32, %arg2: i32) -> (i32, i32) {
    %c0_i32 = arith.constant 0 : i32
    return %arg0, %arg2 : i32, i32
  }
  func.func @transform_1(%arg0: i32, %arg1: i32, %arg2: i32) -> (i32, i32) {
    %c0_i32 = arith.constant 0 : i32
    return %arg2, %arg1 : i32, i32
  }
  func.func @transform_2(%arg0: i32, %arg1: i32, %arg2: i32) -> (i32, i32) {
    %c0_i32 = arith.constant 0 : i32
    %c0_i32_0 = arith.constant 0 : i32
    return %c0_i32, %arg1 : i32, i32
  }
  func.func @transform_3(%arg0: i32, %arg1: i32, %arg2: i32) -> (i32, i32) {
    %c0_i32 = arith.constant 0 : i32
    return %arg0, %arg1 : i32, i32
  }
  func.func @transform_4(%arg0: i32, %arg1: i32, %arg2: i32) -> (i32, i32) {
    %c0_i32 = arith.constant 0 : i32
    return %arg0, %arg1 : i32, i32
  }
}

</mosaic_0001>

<bundles_post_ra>
// kernel: tpu_custom_call.1
= control target key start
LH: loop header
LB: loop body
LE: loop exit
PB: predicated region body
PF: predicated region fallthrough
CT: control target
= control target key end

     0   :  { %9 = vsyncpa [#allocation4], 0  ;;  %s410_s0 = inlined_call_operand.hbm [shape: bf16[8,128], index: 0, kind: input, shape index: {}]   ;;  %s411_s1 = inlined_call_operand.hbm [shape: bf16[128,128], index: 1, kind: input, shape index: {}]   ;;  %s412_s2 = inlined_call_operand.vmem [shape: f32[1,128], index: 2, kind: input, shape index: {}]   ;;  %s413_s3 = inlined_call_operand.vmem [shape: f32[8,128], index: 3, kind: input, shape index: {}]   ;;  %s414_s4 = inlined_call_operand.hbm [shape: bf16[8,128], index: 4, kind: output, shape index: {}]  }
   0x1   :  { %10 = vsyncpa [#allocation7], 0 }
   0x2   :  { %11 = vsyncpa [#allocation5], 0  ;;  %s329_s15 = smov [#allocation3]   ;;  %s330_s17 = smov [#allocation6]  }
   0x3   :  { %s18_s16 = sshll.u32 %s329_s15, 4  ;;  %s27_s18 = sshll.u32 %s330_s17, 4  ;;  %s19_s16 = int_to_ptr.vmem [resolvable:$true] %s18_s16  ;;  %s361_s18 = int_to_ptr.vmem [resolvable:$true] %s27_s18 }
   0x4   :  { %s257_s21 = scalar_lea.hbm %s410_s0, 64 }
   0x5   :  { %p258_p0 = scmp.ne.s32.totalorder %s410_s0, %s257_s21  ;;  %p261_p1 = scmp.lt.u32.totalorder %s257_s21, %s410_s0 }
   0x7   :  { %p263_p2 = pnand %p261_p1, %p258_p0 }
   0x9   :  { %266 = shalt.err (!%p263_p2)
}
   0xa   :  { %s267_s26 = scalar_lea.vmem %s19_s16, 64  ;;  %p272_p4 = scmp.lt.s32.totalorder %s19_s16, %s19_s16 }
   0xb   :  { %p268_p3 = scmp.ne.s32.totalorder %s19_s16, %s267_s26  ;;  %p273_p5 = scmp.lt.s32.totalorder %s267_s26, %s267_s26 }
   0xd   :  { %p274_p6 = por %p273_p5, %p272_p4 }
   0xf   :  { %p275_p7 = pnand %p274_p6, %p268_p3 }
  0x11   :  { %278 = shalt.err (!%p275_p7)
}
  0x12   :  { %21 = dma.hbm_to_vmem [thread:$0]  %s410_s0, 64, %s19_s16, [#allocation4]  }
  0x13   :  { %s279_s5 = scalar_lea.hbm %s411_s1, 1024 }
  0x14   :  { %p280_p8 = scmp.ne.s32.totalorder %s411_s1, %s279_s5  ;;  %p283_p9 = scmp.lt.u32.totalorder %s279_s5, %s411_s1 }
  0x16   :  { %p285_p10 = pnand %p283_p9, %p280_p8 }
  0x18   :  { %288 = shalt.err (!%p285_p10)
}
  0x19   :  { %s289_s10 = scalar_lea.vmem %s361_s18, 1024  ;;  %p294_p12 = scmp.lt.s32.totalorder %s361_s18, %s361_s18 }
  0x1a   :  { %p290_p11 = scmp.ne.s32.totalorder %s361_s18, %s289_s10  ;;  %p295_p13 = scmp.lt.s32.totalorder %s289_s10, %s289_s10 }
  0x1c   :  { %p296_p0 = por %p295_p13, %p294_p12 }
  0x1e   :  { %p297_p1 = pnand %p296_p0, %p290_p11 }
  0x20   :  { %300 = shalt.err (!%p297_p1)
}
  0x21   :  { %s331_s0 = smov 64   ;;  %s332_s11 = smov 4  }
  0x22   :  { %33 = dma.hbm_to_vmem [thread:$0]  %s411_s1, 1024, %s361_s18, [#allocation7], %s331_s0, %s331_s0, %s332_s11  }
  0x23   :  { %323 = dma.done.wait [#allocation4], 64  }
  0x24   :  { %324 = vsyncadd [#allocation4], 4294967232 }
  0x25   :  { %325 = dma.done.wait [#allocation7], 1024  }
  0x26   :  { %326 = vsyncadd [#allocation7], 4294966272  ;;  %v333_v0 = vmov 0.0   ;;  %vm334_vm0 = vmmov 0   ;;  %v245_v1 = vld [vmem:[#allocation6] sm:$0xff]   ;;  %v246_v2 = vld [vmem:[#allocation6 + $0x8] sm:$0xff]  }
  0x27   :  { %218 = vmatprep.subr.bf16.mxu0 %v333_v0  ;;  %234 = vmatprep.mubr.msk.bf16.mxu0 %vm334_vm0, %v333_v0  ;;  %v247_v3 = vld [vmem:[#allocation6 + $0x10] sm:$0xff]   ;;  %v248_v4 = vld [vmem:[#allocation6 + $0x18] sm:$0xff]   ;;  %v249_v5 = vld [vmem:[#allocation6 + $0x20] sm:$0xff]   ;;  %s335_s17 = smov [#allocation8]  }
  0x28   :  { %219 = vmatpush3.bf16.msra.mxu0 %v245_v1  ;;  %v250_v6 = vld [vmem:[#allocation6 + $0x28] sm:$0xff]   ;;  %v251_v7 = vld [vmem:[#allocation6 + $0x30] sm:$0xff]   ;;  %v252_v8 = vld [vmem:[#allocation6 + $0x38] sm:$0xff]   ;;  %s188_s18 = sshll.u32 %s335_s17, 4  ;;  %s189_s18 = int_to_ptr.vmem [resolvable:$true] %s188_s18 }
  0x29   :  { %220 = vmatprep.subr.bf16.mxu0 %v333_v0  ;;  %v51_v9 = vld [vmem:[#allocation3] sm:$0xf]  ;;  %v206_v10 = vld [vmem:[%s412_s2] ss:$0 sm:$0xff]  ;;  %s301_s2 = scalar_lea.vmem %s189_s18, 64  ;;  %p306_p3 = scmp.lt.s32.totalorder %s189_s18, %s189_s18 }
  0x2a   :  { %v176_v19 = vld [vmem:[%s413_s3] sm:$0xff]  ;;  %p302_p2 = scmp.ne.s32.totalorder %s189_s18, %s301_s2  ;;  %p307_p4 = scmp.lt.s32.totalorder %s301_s2, %s301_s2 }
  0x2c   :  { %221 = vmatpush3.bf16.msra.mxu0 %v246_v2  ;;  %p308_p5 = por %p307_p4, %p306_p3 }
  0x2d   :  { %222 = vmatprep.subr.bf16.mxu0 %v333_v0 }
  0x2e   :  { %p309_p6 = pnand %p308_p5, %p302_p2 }
  0x30   :  { %223 = vmatpush3.bf16.msra.mxu0 %v247_v3 }
  0x31   :  { %224 = vmatprep.subr.bf16.mxu0 %v333_v0 }
  0x34   :  { %225 = vmatpush3.bf16.msra.mxu0 %v248_v4 }
  0x35   :  { %226 = vmatprep.subr.bf16.mxu0 %v333_v0 }
  0x38   :  { %227 = vmatpush3.bf16.msra.mxu0 %v249_v5 }
  0x39   :  { %228 = vmatprep.subr.bf16.mxu0 %v333_v0 }
  0x3c   :  { %229 = vmatpush3.bf16.msra.mxu0 %v250_v6 }
  0x3d   :  { %230 = vmatprep.subr.bf16.mxu0 %v333_v0 }
  0x40   :  { %231 = vmatpush3.bf16.msra.mxu0 %v251_v7 }
  0x41   :  { %232 = vmatprep.subr.bf16.mxu0 %v333_v0 }
  0x44   :  { %233 = vmatpush3.bf16.msra.mxu0 %v252_v8 }
  0x47   :  { %235 = vmatmul.mubr.bf16.vlgmr.msra.gmra.mrb[0].mxu0 %v51_v9 }
 0x11a   :  { %v150_v11 = vpop.f32.mrb[0].mxu0 }
 0x11b   :  { %v169_v12 = vadd.f32 %v206_v10, %v150_v11  ;;  %v236_v13 = vpop.f32.mrb[1].mxu0 }
 0x11c   :  { %v153_v14 = vpop.f32.mrb[2].mxu0 }
 0x11d   :  { %v207_v15 = vmul.f32 -1.442695, %v169_v12  ;;  %v237_v16 = vpop.f32.mrb[3].mxu0 }
 0x11f   :  { %253 = vpow2.f32 %v207_v15 }
 0x129   :  { %v254_v17 = vpop.eup %253 }
 0x12a   :  { %v173_v18 = vadd.f32 1.0, %v254_v17 }
 0x12c   :  { %255 = vrcp.f32 %v173_v18 }
 0x136   :  { %v256_v20 = vpop.eup %255 }
 0x137   :  { %vm177_vm1 = vcmp.lt.f32.partialorder %v176_v19, %v256_v20 }
 0x138   :  { %v208_v21 = vsel %vm177_vm1, 1.0, %v333_v0 }
 0x139   :  { %v180_v22 = vpack.c.bf16 %v208_v21, %v208_v21 }
 0x13b   :  { %181 = vst [vmem:[#allocation8] sm:$0xf] %v180_v22 }
 0x13c   :  { %312 = shalt.err (!%p309_p6)
}
 0x13d   :  { %s313_s21 = scalar_lea.hbm %s414_s4, 64 }
 0x13e   :  { %p314_p7 = scmp.ne.s32.totalorder %s414_s4, %s313_s21  ;;  %p317_p8 = scmp.lt.u32.totalorder %s313_s21, %s414_s4 }
 0x140   :  { %p319_p9 = pnand %p317_p8, %p314_p7 }
 0x142   :  { %322 = shalt.err (!%p319_p9)
}
 0x143   :  { %191 = dma.vmem_to_hbm [thread:$0]  %s189_s18, 64, %s414_s4, [#allocation5]  }
 0x144   :  { %327 = dma.done.wait [#allocation5], 64  }
 0x145   :  { %328 = vsyncadd [#allocation5], 4294967232 }
 0x146   :  { %195 = vsyncpa [#allocation4], 1 }
 0x147   :  { %196 = vsyncpa [#allocation7], 1 }
 0x148   :  { %197 = vsyncpa [#allocation5], 1 }

</bundles_post_ra>
